<compile_context>
chip_gen: v6e
topology: v6e:2x2x1
jax: 0.10.0
libtpu: 0.0.40
codegen_flags: <defaults>
</compile_context>

<pallas_src>
import functools

import jax
import jax.numpy as jnp
from jax import lax
from jax.experimental import pallas as pl
from jax.experimental.pallas import tpu as pltpu

_LANE = 128
_MIB = 1024 * 1024


def _round_up(x, m):
    return ((x + m - 1) // m) * m


def _gram_mse_kernel_single(f_ref, t_ref, g_ref, loss_ref, *, scale, n_true,
                            use_bf16):
    """Whole-feature-block weighted Gram + fused MSE epilogue."""
    f = f_ref[...]
    f = f.astype(jnp.bfloat16) if use_bf16 else f.astype(jnp.float32)
    g = lax.dot_general(
        f, f,
        dimension_numbers=(((1,), (1,)), ((), ())),   # contract last axis of both
        preferred_element_type=jnp.float32) * scale
    g_ref[...] = g
    diff = g - t_ref[...]
    loss_ref[0] = jnp.sum(diff * diff) * (1.0 / float(n_true * n_true))


def _gram_mse_kernel_ktiled(f_ref, t_ref, g_ref, loss_ref, *, scale, n_true,
                            use_bf16):
    """K-tiled weighted Gram accumulating directly into the resident output tile."""
    k = pl.program_id(0)

    @pl.when(k == 0)
    def _():
        g_ref[...] = jnp.zeros_like(g_ref)

    f = f_ref[...]
    f = f.astype(jnp.bfloat16) if use_bf16 else f.astype(jnp.float32)
    g_ref[...] += lax.dot_general(
        f, f,
        dimension_numbers=(((1,), (1,)), ((), ())),
        preferred_element_type=jnp.float32)

    @pl.when(k == pl.num_programs(0) - 1)
    def _():
        g = g_ref[...] * scale
        g_ref[...] = g
        diff = g - t_ref[...]
        loss_ref[0] = jnp.sum(diff * diff) * (1.0 / float(n_true * n_true))


def _weighted_gram_and_mse(features, target, scale, *, use_bf16=False,
                           single_block_bytes=2 * _MIB,
                           ktile_target_bytes=4 * _MIB,
                           ktile_vmem_budget=24 * _MIB):
    """Returns (G, loss) with G = (F @ F^T) * scale and loss = mean((G-target)^2)."""
    n, kdim = features.shape
    target = target.astype(jnp.float32)
    feat_bytes = n * kdim * 4

    out_shape = (jax.ShapeDtypeStruct((n, n), jnp.float32),
                 jax.ShapeDtypeStruct((1,), jnp.float32))
    loss_spec = pl.BlockSpec(memory_space=pltpu.MemorySpace.SMEM)

    if feat_bytes <= single_block_bytes:
        # Small feature map: one invocation, no reduction grid.
        G, loss = pl.pallas_call(
            functools.partial(_gram_mse_kernel_single, scale=scale, n_true=n,
                              use_bf16=use_bf16),
            out_shape=out_shape,
            in_specs=[pl.BlockSpec((n, kdim), lambda: (0, 0)),
                      pl.BlockSpec((n, n), lambda: (0, 0))],
            out_specs=(pl.BlockSpec((n, n), lambda: (0, 0)), loss_spec),
            compiler_params=pltpu.CompilerParams(vmem_limit_bytes=16 * _MIB),
        )(features, target)
        return G, loss[0]

    # ---- K-tiled path for large feature maps ----------------------------------
    # Byte-budgeted K tile (~4 MiB/step), clamped to [2048, 8192] lanes ...
    tk = ktile_target_bytes // (4 * n)
    tk = max(2048, min(8192, tk))
    # ... capped so 2 (double-buffer) * n*tk*4 + output/target tiles fit the budget,
    tk_cap = (ktile_vmem_budget - 3 * n * n * 4) // (2 * n * 4)
    tk_cap = max(_LANE, (tk_cap // _LANE) * _LANE)
    tk = max(_LANE, (min(tk, tk_cap) // _LANE) * _LANE)
    # ... then rebalanced across the K steps to minimize zero padding.
    num_steps = -(-kdim // tk)
    tk = min(tk, _round_up(-(-kdim // num_steps), _LANE))
    kdim_p = tk * num_steps

    if kdim_p != kdim:
        # Zero-padding the contraction tail is exactly correct for a Gram matrix.
        features = jnp.pad(features, ((0, 0), (0, kdim_p - kdim)))

    vmem_limit = min(64 * _MIB,
                     max(16 * _MIB, 2 * n * tk * 4 + 4 * n * n * 4 + 2 * _MIB))

    # TODO(synk): on v7x add pipeline_mode=pl.Buffered(3) on the feature spec and a
    # leading 'parallel' output-row grid axis (2nd TensorCore) for compute-bound n>=256;
    # output tiling would also be needed for n large enough that (n,n) overflows VMEM.
    G, loss = pl.pallas_call(
        functools.partial(_gram_mse_kernel_ktiled, scale=scale, n_true=n,
                          use_bf16=use_bf16),
        out_shape=out_shape,
        grid_spec=pltpu.PrefetchScalarGridSpec(
            num_scalar_prefetch=0,
            grid=(num_steps,),
            in_specs=[pl.BlockSpec((n, tk), lambda k: (0, k)),
                      pl.BlockSpec((n, n), lambda k: (0, 0))],
            out_specs=(pl.BlockSpec((n, n), lambda k: (0, 0)), loss_spec),
        ),
        compiler_params=pltpu.CompilerParams(
            dimension_semantics=("arbitrary",),
            vmem_limit_bytes=vmem_limit),
    )(features, target)
    return G, loss[0]


def style_loss_forward(x_nchw, target, weight, *, use_bf16=False):
    """Returns (output, G, loss) matching StyleLoss.forward + its stored attributes.

    x_nchw : (a, b, c, d) float32, NCHW
    target : (a*b, a*b) float32 (already includes the * weight factor, as in
             StyleLoss.__init__)
    weight : python float
    """
    a, b, c, d = x_nchw.shape
    n = a * b
    kdim = c * d

    features = x_nchw.reshape(n, kdim)            # row-major, same as torch .view
    scale = float(weight) / float(a * b * c * d)  # (F F^T / (a*b*c*d)) * weight

    G, loss = _weighted_gram_and_mse(features, target, scale, use_bf16=use_bf16)

    # output = input.clone(): JAX arrays are immutable, so the input itself is
    # semantically identical to a clone — no data movement needed.
    return x_nchw, G, loss


def _reference(x_nchw, target, weight):
    a, b, c, d = x_nchw.shape
    f = x_nchw.reshape(a * b, c * d).astype(jnp.float32)
    G = jnp.matmul(f, f.T, precision=jax.lax.Precision.HIGHEST)
    G = G / float(a * b * c * d) * weight
    loss = jnp.mean((G - target) ** 2)
    return x_nchw, G, loss


def _make_case(key, shape, weight):
    k_in, k_style = jax.random.split(key)
    a, b, c, d = shape
    x = jax.random.normal(k_in, shape, dtype=jnp.float32)
    style = jax.random.normal(k_style, shape, dtype=jnp.float32)
    sf = style.reshape(a * b, c * d)
    target = jnp.matmul(sf, sf.T, precision=jax.lax.Precision.HIGHEST)
    target = target / float(a * b * c * d) * weight   # StyleLoss.__init__ target
    return x, target


if __name__ == "__main__":
    key = jax.random.PRNGKey(0)
    k_small, k_big = jax.random.split(key)
    weight = 1000.0

    # --- small NCHW input (single-block path), as the module implies ---
    x, target = _make_case(k_small, (2, 4, 16, 16), weight)
    out, G, loss = style_loss_forward(x, target, weight)
    jax.block_until_ready((out, G, loss))

    ref_out, ref_G, ref_loss = _reference(x, target, weight)
    assert jnp.allclose(out, ref_out), "output mismatch"
    assert jnp.allclose(G, ref_G, rtol=1e-4, atol=1e-4), "Gram mismatch"
    assert jnp.allclose(loss, ref_loss, rtol=1e-4, atol=1e-3), "loss mismatch"

    # --- larger feature map exercising the K-tiled (reduction-grid) path ---
    x2, target2 = _make_case(k_big, (1, 64, 96, 96), weight)   # kdim = 9216
    out2, G2, loss2 = style_loss_forward(x2, target2, weight)
    jax.block_until_ready((out2, G2, loss2))

    ref_out2, ref_G2, ref_loss2 = _reference(x2, target2, weight)
    assert jnp.allclose(out2, ref_out2), "output mismatch (ktiled)"
    assert jnp.allclose(G2, ref_G2, rtol=1e-4, atol=1e-4), "Gram mismatch (ktiled)"
    assert jnp.allclose(loss2, ref_loss2, rtol=1e-4, atol=1e-3), "loss mismatch (ktiled)"

    print("KERNEL_OK")
</pallas_src>

<mosaic_0001>
module attributes {stable_mosaic.version = 11 : i64} {
  func.func @_gram_mse_kernel_single(%arg0: memref<8x256xf32, #tpu.memory_space<vmem>>, %arg1: memref<8x8xf32, #tpu.memory_space<vmem>>, %arg2: memref<8x8xf32, #tpu.memory_space<vmem>>, %arg3: memref<1xf32, #tpu.memory_space<smem>>) attributes {dimension_semantics = [], scalar_prefetch = 0 : i64, scratch_operands = 0 : i64, tpu.core_type = #tpu.core_type<tc>} {
    %c0 = arith.constant 0 : index
    %c0_0 = arith.constant 0 : index
    %0 = vector.load %arg0[%c0, %c0_0] : memref<8x256xf32, #tpu.memory_space<vmem>>, vector<8x256xf32>
    %cst = arith.constant dense<0.000000e+00> : vector<8x8xf32>
    %1 = tpu.matmul %0, %0, %cst {dimension_numbers = #tpu.dot_dimension_numbers<[1], [1], [0], [0], [0, 0, 1, 0], [], []>} : vector<8x256xf32>, vector<8x256xf32>, vector<8x8xf32> -> vector<8x8xf32>
    %cst_1 = arith.constant 0.48828125 : f32
    %2 = vector.broadcast %cst_1 : f32 to vector<8x8xf32>
    %3 = arith.mulf %1, %2 : vector<8x8xf32>
    %c0_2 = arith.constant 0 : index
    %c0_3 = arith.constant 0 : index
    %4 = vector.load %arg2[%c0_2, %c0_3] : memref<8x8xf32, #tpu.memory_space<vmem>>, vector<8x8xf32>
    tpu.vector_store %arg2[%c0_2, %c0_3], %3 {strides = array<i32>} : memref<8x8xf32, #tpu.memory_space<vmem>>, vector<8x8xf32>,
    %c0_4 = arith.constant 0 : index
    %c0_5 = arith.constant 0 : index
    %5 = vector.load %arg1[%c0_4, %c0_5] : memref<8x8xf32, #tpu.memory_space<vmem>>, vector<8x8xf32>
    %6 = arith.subf %3, %5 : vector<8x8xf32>
    %7 = arith.mulf %6, %6 : vector<8x8xf32>
    %8 = vector.shape_cast %7 : vector<8x8xf32> to vector<1x8x8xf32>
    %cst_6 = arith.constant dense<0.000000e+00> : vector<1xf32>
    %9 = vector.multi_reduction <add>, %8, %cst_6 [1, 2] : vector<1x8x8xf32> to vector<1xf32>
    %10 = vector.shape_cast %9 : vector<1xf32> to vector<1x1x1xf32>
    %11 = vector.extract %10[0, 0, 0] : f32 from vector<1x1x1xf32>
    %cst_7 = arith.constant 1.562500e-02 : f32
    %12 = arith.mulf %11, %cst_7 : f32
    %c0_8 = arith.constant 0 : index
    %13 = memref.load %arg3[%c0_8] : memref<1xf32, #tpu.memory_space<smem>>
    memref.store %12, %arg3[%c0_8] : memref<1xf32, #tpu.memory_space<smem>>
    return
  }
}

</mosaic_0001>

<bundles_post_ra>
// kernel: tpu_custom_call.1
= control target key start
LH: loop header
LB: loop body
LE: loop exit
PB: predicated region body
PF: predicated region fallthrough
CT: control target
= control target key end

     0   :  { %9 = vsyncpa [#allocation3], 0  ;;  %s277_s0 = inlined_call_operand.hbm [shape: f32[8,256], index: 0, kind: input, shape index: {}]   ;;  %s278_s1 = inlined_call_operand.hbm [shape: f32[8,8], index: 1, kind: input, shape index: {}]   ;;  %s279_s2 = inlined_call_operand.hbm [shape: f32[8,8], index: 2, kind: output, shape index: {0}]   ;;  %s280_s3 = inlined_call_operand.hbm [shape: f32[1], index: 3, kind: output, shape index: {1}]  }
   0x1   :  { %10 = vsyncpa [#allocation7], 0 }
   0x2   :  { %11 = vsyncpa [#allocation4], 0 }
   0x3   :  { %12 = vsyncpa [#allocation5], 0  ;;  %s241_s12 = smov [#allocation2]   ;;  %s242_s14 = smov [#allocation6]  }
   0x4   :  { %s19_s13 = sshll.u32 %s241_s12, 4  ;;  %s29_s15 = sshll.u32 %s242_s14, 4  ;;  %s20_s13 = int_to_ptr.vmem [resolvable:$true] %s19_s13  ;;  %s30_s15 = int_to_ptr.vmem [resolvable:$true] %s29_s15 }
   0x5   :  { %s173_s16 = scalar_lea.vmem %s20_s13, 256  ;;  %p178_p1 = scmp.lt.s32.totalorder %s20_s13, %s20_s13 }
   0x6   :  { %p174_p0 = scmp.ne.s32.totalorder %s20_s13, %s173_s16  ;;  %p179_p2 = scmp.lt.s32.totalorder %s173_s16, %s173_s16 }
   0x8   :  { %p180_p3 = por %p179_p2, %p178_p1 }
   0xa   :  { %p181_p4 = pnand %p180_p3, %p174_p0 }
   0xc   :  { %184 = shalt.err (!%p181_p4)
}
   0xd   :  { %22 = dma.hbm_to_vmem [thread:$0]  %s277_s0, 256, %s20_s13, [#allocation3]  }
   0xe   :  { %s193_s19 = scalar_lea.vmem %s30_s15, 128  ;;  %p198_p6 = scmp.lt.s32.totalorder %s30_s15, %s30_s15 }
   0xf   :  { %p194_p5 = scmp.ne.s32.totalorder %s30_s15, %s193_s19  ;;  %p199_p7 = scmp.lt.s32.totalorder %s193_s19, %s193_s19 }
  0x11   :  { %p200_p8 = por %p199_p7, %p198_p6 }
  0x13   :  { %p201_p9 = pnand %p200_p8, %p194_p5 }
  0x15   :  { %204 = shalt.err (!%p201_p9)
}
  0x16   :  { %32 = dma.hbm_to_vmem [thread:$0]  %s278_s1, 128, %s30_s15, [#allocation7]  }
  0x17   :  { %233 = dma.done.wait [#allocation3], 256  }
  0x18   :  { %234 = vsyncadd [#allocation3], 4294967040 }
  0x19   :  { %235 = dma.done.wait [#allocation7], 128  }
  0x1a   :  { %236 = vsyncadd [#allocation7], 4294967168  ;;  %v40_v0 = vld [vmem:[#allocation2 + $0x8] sm:$0xff]  ;;  %v39_v1 = vld [vmem:[#allocation2] sm:$0xff]  ;;  %vm112_vm0 = vcmask 64512   ;;  %s243_s0 = smov [#allocation8]  }
  0x1b   :  { %71 = vmatprep.subr.mxu0 %v40_v0  ;;  %105 = vmatprep.mubr.f32.mxu0 %v40_v0  ;;  %v114_v3 = vld [vmem:[#allocation6] sm:$0xff]  ;;  %s136_s1 = sshll.u32 %s243_s0, 4  ;;  %s137_s1 = int_to_ptr.vmem [resolvable:$true] %s136_s1 }
  0x1c   :  { %72 = vmatpush1.xpose.msra.mxu0 %v39_v1  ;;  %s205_s22 = scalar_lea.vmem %s137_s1, 128  ;;  %p210_p11 = scmp.lt.s32.totalorder %s137_s1, %s137_s1 }
  0x1d   :  { %p206_p10 = scmp.ne.s32.totalorder %s137_s1, %s205_s22  ;;  %p211_p12 = scmp.lt.s32.totalorder %s205_s22, %s205_s22 }
  0x1f   :  { %106 = vmatmul.mubr.f32.vlgmr.msra.gmra.mxu0 %v39_v1  ;;  %p212_p13 = por %p211_p12, %p210_p11 }
  0x21   :  { %p213_p0 = pnand %p212_p13, %p206_p10 }
  0xdf   :  { %v107_v2 = vpop.f32.mrf.mxu0 }
  0xe0   :  { %v111_v4 = vmul.f32 0.48828125, %v107_v2 }
  0xe1   :  { %v109_v5 = vpop.f32.mrf.mxu0 }
  0xe2   :  { %v115_v6 = vsub.f32 %v111_v4, %v114_v3  ;;  %113 = vst.msk [vmem:[#allocation8] sm:$0xff] %vm112_vm0, %v111_v4 }
  0xe4   :  { %v116_v7 = vmul.f32 %v115_v6, %v115_v6 }
  0xe6   :  { %v117_v8 = vsel %vm112_vm0, %v116_v7, 0.0 }
  0xe7   :  { %118 = vadd.xlane.f32.xlu0 %v117_v8 }
  0xe8   :  { %216 = shalt.err (!%p213_p0)
}
  0xe9   :  { %139 = dma.vmem_to_hbm [thread:$0]  %s137_s1, 128, %s279_s2, [#allocation4]  }
  0xea   :  { %s244_s27 = smov [#allocation9]  }
 0x170   :  { %v119_v9 = vpop.xlane.xlu0 %118 }
 0x171   :  { %v120_v10 = vrot.slane %v119_v9, 4 }
 0x173   :  { %v121_v11 = vadd.f32 %v120_v10, %v119_v9 }
 0x175   :  { %v122_v12 = vrot.slane %v121_v11, 2 }
 0x177   :  { %v123_v13 = vadd.f32 %v122_v12, %v121_v11 }
 0x179   :  { %v124_v14 = vrot.slane %v123_v13, 1 }
 0x17b   :  { %v125_v15 = vadd.f32 %v124_v14, %v123_v13 }
 0x17d   :  { %159 = vpush %v125_v15 }
 0x1ae   :  { %s160_s25 = spop %159 }
 0x1af   :  { %s127_s26 = smul.f32 0.015625, %s160_s25 }
 0x1b1   :  { %129 = sst [smem:[#allocation9]] %s127_s26 }
 0x1b2   :  { %147 = dma.smem_to_hbm %s244_s27, 16, %s280_s3, [#allocation5]  }
 0x1b3   :  { %237 = dma.done.wait [#allocation4], 128  }
 0x1b4   :  { %238 = vsyncadd [#allocation4], 4294967168 }
 0x1b5   :  { %239 = dma.done.wait [#allocation5], 16  }
 0x1b6   :  { %240 = vsyncadd [#allocation5], 4294967280 }
 0x1b7   :  { %154 = sfence }
 0x1b8   :  { %155 = vsyncpa [#allocation3], 1 }
 0x1b9   :  { %156 = vsyncpa [#allocation7], 1 }
 0x1ba   :  { %157 = vsyncpa [#allocation4], 1 }
 0x1bb   :  { %158 = vsyncpa [#allocation5], 1 }

</bundles_post_ra>
